<compile_context>
chip_gen: v7x
topology: tpu7x:2x2x1
jax: 0.10.0
libtpu: 0.0.40
codegen_flags: <defaults>
</compile_context>

<pallas_src>
import functools

import jax
import jax.numpy as jnp
from jax.experimental import pallas as pl
from jax.experimental.pallas import tpu as pltpu

K = 5     # conv kernel size
PAD = 2   # conv padding


def _shifted_rows(v, shift, seq_len, pos_in_seq):
    """Roll `v` by `shift` rows; zero rows that crossed a sequence boundary."""
    rows = v.shape[0]
    if shift == 0:
        return v
    rolled = pltpu.roll(v, shift=shift % rows, axis=0)
    if shift > 0:
        mask = pos_in_seq >= shift
    else:
        mask = pos_in_seq < seq_len + shift
    return jnp.where(mask, rolled, jnp.zeros_like(rolled))


def _im2col(v, seq_len, pos_in_seq):
    """(rows, C) -> (rows, K*C): the K=5 time-shifted views concatenated on lanes."""
    cols = [_shifted_rows(v, PAD - k, seq_len, pos_in_seq) for k in range(K)]
    return jnp.concatenate(cols, axis=1)


def fish_speech_kernel(x_ref, w1_ref, b1_ref, w2_ref, b2_ref,
                       cw1_ref, cb1_ref, bns_ref, bnb_ref,
                       cw2_ref, cb2_ref,
                       out_ref, *, seq_len):
    rows = x_ref.shape[0]
    mxu_dtype = w1_ref.dtype

    # Position of each flattened row inside its sequence (conv boundary mask).
    pos = jax.lax.broadcasted_iota(jnp.int32, (rows, 1), 0) % seq_len

    # ---- encoder: Linear -> ReLU  (Dropout == identity in eval) ----
    h = jnp.maximum(
        jnp.dot(x_ref[...], w1_ref[...], preferred_element_type=jnp.float32)
        + b1_ref[...], 0.0)                                          # (rows, H) f32

    # ---- decoder: Linear -> Tanh ----
    dec = jnp.tanh(
        jnp.dot(h.astype(mxu_dtype), w2_ref[...],
                preferred_element_type=jnp.float32) + b2_ref[...])   # (rows, Dout) f32

    # ---- postnet conv1: Conv1d(Dout -> P, k=5, pad=2) as one im2col matmul ----
    c1 = jnp.dot(_im2col(dec, seq_len, pos).astype(mxu_dtype), cw1_ref[...],
                 preferred_element_type=jnp.float32) + cb1_ref[...]  # (rows, P)

    # ---- BatchNorm1d (eval, folded affine) + Tanh  (Dropout == identity) ----
    h2 = jnp.tanh(c1 * bns_ref[...] + bnb_ref[...])                  # (rows, P) f32

    # ---- postnet conv2: Conv1d(P -> Dout, k=5, pad=2) as one im2col matmul ----
    c2 = jnp.dot(_im2col(h2, seq_len, pos).astype(mxu_dtype), cw2_ref[...],
                 preferred_element_type=jnp.float32) + cb2_ref[...]  # (rows, Dout)

    # ---- residual: final = dec + postnet(dec) ----
    out_ref[...] = dec + c2


def fish_speech_forward(x, p, *, mxu_dtype=jnp.bfloat16, batch_block=None):
    B, T, Din = x.shape
    H = p['w1'].shape[1]
    Dout = p['w2'].shape[1]
    P = p['cw1'].shape[2]

    if batch_block is None:
        batch_block = B            # whole batch in a single grid step at these sizes
    assert B % batch_block == 0
    nb = B // batch_block
    rows_blk = batch_block * T

    # Wrapper-side prep (all metadata / tiny casts):
    #   * flatten batch*time so the kernel works on lane-major 2-D tiles,
    #   * cast MXU operands to bf16,
    #   * fold conv weights (K, Cin, Cout) -> (K*Cin, Cout) for the im2col matmuls.
    x2 = x.reshape(B * T, Din).astype(mxu_dtype)
    w1 = p['w1'].astype(mxu_dtype)
    w2 = p['w2'].astype(mxu_dtype)
    cw1 = p['cw1'].reshape(K * Dout, P).astype(mxu_dtype)
    cw2 = p['cw2'].reshape(K * P, Dout).astype(mxu_dtype)

    def rep(shape):
        return pl.BlockSpec(shape, lambda i: (0,) * len(shape))

    grid_spec = pltpu.PrefetchScalarGridSpec(
        num_scalar_prefetch=0,
        grid=(nb,),
        in_specs=[
            pl.BlockSpec((rows_blk, Din), lambda i: (i, 0)),  # x (flattened rows)
            rep((Din, H)), rep((1, H)),                       # encoder linear
            rep((H, Dout)), rep((1, Dout)),                   # decoder linear
            rep((K * Dout, P)), rep((1, P)),                  # postnet conv1 (im2col W)
            rep((1, P)), rep((1, P)),                         # folded batchnorm
            rep((K * P, Dout)), rep((1, Dout)),               # postnet conv2 (im2col W)
        ],
        out_specs=pl.BlockSpec((rows_blk, Dout), lambda i: (i, 0)),
    )

    def nbytes(a):
        return a.size * a.dtype.itemsize

    flops = 2 * B * T * (Din * H + H * Dout + K * Dout * P + K * P * Dout)
    transcendentals = B * T * (Dout + P)
    bytes_accessed = sum(nbytes(a) for a in (
        x2, w1, w2, cw1, cw2, p['b1'], p['b2'], p['cb1'], p['cb2'],
        p['bn_scale'], p['bn_shift'])) + B * T * Dout * 4

    out = pl.pallas_call(
        functools.partial(fish_speech_kernel, seq_len=T),
        out_shape=jax.ShapeDtypeStruct((B * T, Dout), jnp.float32),
        grid_spec=grid_spec,
        compiler_params=pltpu.CompilerParams(
            dimension_semantics=("parallel",)),
        cost_estimate=pl.CostEstimate(flops=flops,
                                      transcendentals=transcendentals,
                                      bytes_accessed=bytes_accessed),
    )(x2, w1, p['b1'], w2, p['b2'],
      cw1, p['cb1'], p['bn_scale'], p['bn_shift'],
      cw2, p['cb2'])
    return out.reshape(B, T, Dout)


def reference_forward(x, p, *, mxu_dtype=jnp.bfloat16):
    """Pure-JAX reference with the same mixed-precision policy (bf16 MXU
    operands, f32 accumulation and elementwise math).  Uses lax.conv to
    independently validate the im2col conv formulation."""
    f32 = jnp.float32
    xm = x.astype(mxu_dtype)
    h = jnp.maximum(
        jnp.einsum('btd,dh->bth', xm, p['w1'].astype(mxu_dtype),
                   preferred_element_type=f32) + p['b1'][0], 0.0)
    dec = jnp.tanh(
        jnp.einsum('bth,ho->bto', h.astype(mxu_dtype), p['w2'].astype(mxu_dtype),
                   preferred_element_type=f32) + p['b2'][0])
    dct = jnp.transpose(dec, (0, 2, 1)).astype(mxu_dtype)            # (B, Dout, T)
    w1_oik = jnp.transpose(p['cw1'], (2, 1, 0)).astype(mxu_dtype)    # (P, Dout, K)
    c1 = jax.lax.conv_general_dilated(
        dct, w1_oik, window_strides=(1,), padding=[(PAD, PAD)],
        dimension_numbers=('NCH', 'OIH', 'NCH'), preferred_element_type=f32)
    c1 = c1 + p['cb1'][0][None, :, None]
    h2 = jnp.tanh(c1 * p['bn_scale'][0][None, :, None]
                  + p['bn_shift'][0][None, :, None])
    w2_oik = jnp.transpose(p['cw2'], (2, 1, 0)).astype(mxu_dtype)    # (Dout, P, K)
    c2 = jax.lax.conv_general_dilated(
        h2.astype(mxu_dtype), w2_oik, window_strides=(1,), padding=[(PAD, PAD)],
        dimension_numbers=('NCH', 'OIH', 'NCH'), preferred_element_type=f32)
    c2 = c2 + p['cb2'][0][None, :, None]
    return dec + jnp.transpose(c2, (0, 2, 1))


def make_params(key, din, hid, dout, pnet):
    ks = jax.random.split(key, 14)
    s = 0.1
    f32 = jnp.float32
    gamma = 1.0 + 0.05 * jax.random.normal(ks[10], (1, pnet), dtype=f32)
    beta = 0.05 * jax.random.normal(ks[11], (1, pnet), dtype=f32)
    run_mean = 0.02 * jax.random.normal(ks[12], (1, pnet), dtype=f32)
    run_var = 1.0 + 0.1 * jax.nn.softplus(
        jax.random.normal(ks[13], (1, pnet), dtype=f32))
    eps = 1e-5
    bn_scale = gamma / jnp.sqrt(run_var + eps)
    bn_shift = beta - run_mean * bn_scale
    return {
        'w1': s * jax.random.normal(ks[0], (din, hid), dtype=f32),
        'b1': s * jax.random.normal(ks[1], (1, hid), dtype=f32),
        'w2': s * jax.random.normal(ks[2], (hid, dout), dtype=f32),
        'b2': s * jax.random.normal(ks[3], (1, dout), dtype=f32),
        'cw1': s * jax.random.normal(ks[4], (K, dout, pnet), dtype=f32),
        'cb1': s * jax.random.normal(ks[5], (1, pnet), dtype=f32),
        'cw2': s * jax.random.normal(ks[6], (K, pnet, dout), dtype=f32),
        'cb2': s * jax.random.normal(ks[7], (1, dout), dtype=f32),
        'bn_scale': bn_scale,
        'bn_shift': bn_shift,
    }


if __name__ == "__main__":
    # Small shapes consistent with the module: config = dict(
    #   input_dim=32, hidden_dim=32, output_dim=16, postnet_dim=32)
    B, T = 2, 16
    DIN, HID, DOUT, PNET = 32, 32, 16, 32

    key = jax.random.PRNGKey(0)
    kx, kp = jax.random.split(key)
    x = jax.random.normal(kx, (B, T, DIN), dtype=jnp.float32)
    params = make_params(kp, DIN, HID, DOUT, PNET)

    out = fish_speech_forward(x, params)
    out = jax.block_until_ready(out)

    ref = reference_forward(x, params)
    assert out.shape == (B, T, DOUT)
    # bf16 MXU operands => compare against a reference with the same precision
    # policy; residual tolerance covers accumulation-order / rounding noise.
    assert jnp.allclose(out, ref, atol=5e-3, rtol=5e-3), \
        f"max abs err {jnp.max(jnp.abs(out - ref))}"

    print("KERNEL_OK")
</pallas_src>

<mosaic_0001>
module attributes {stable_mosaic.version = 11 : i64} {
  func.func @fish_speech_kernel(%arg0: i32, %arg1: memref<32x32xbf16, #tpu.memory_space<vmem>>, %arg2: memref<32x32xbf16, #tpu.memory_space<vmem>>, %arg3: memref<1x32xf32, #tpu.memory_space<vmem>>, %arg4: memref<32x16xbf16, #tpu.memory_space<vmem>>, %arg5: memref<1x16xf32, #tpu.memory_space<vmem>>, %arg6: memref<80x32xbf16, #tpu.memory_space<vmem>>, %arg7: memref<1x32xf32, #tpu.memory_space<vmem>>, %arg8: memref<1x32xf32, #tpu.memory_space<vmem>>, %arg9: memref<1x32xf32, #tpu.memory_space<vmem>>, %arg10: memref<160x16xbf16, #tpu.memory_space<vmem>>, %arg11: memref<1x16xf32, #tpu.memory_space<vmem>>, %arg12: memref<32x16xf32, #tpu.memory_space<vmem>>) attributes {dimension_semantics = [#tpu.dimension_semantics<parallel>], iteration_bounds = array<i64: 1>, scalar_prefetch = 0 : i64, scratch_operands = 0 : i64, tpu.core_type = #tpu.core_type<tc>, window_params = [{transform_indices = @transform_0, window_bounds = array<i64: 32, 32>}, {pipeline_mode = #tpu.pipeline_mode<synchronous>, transform_indices = @transform_1, window_bounds = array<i64: 32, 32>}, {pipeline_mode = #tpu.pipeline_mode<synchronous>, transform_indices = @transform_2, window_bounds = array<i64: 1, 32>}, {pipeline_mode = #tpu.pipeline_mode<synchronous>, transform_indices = @transform_3, window_bounds = array<i64: 32, 16>}, {pipeline_mode = #tpu.pipeline_mode<synchronous>, transform_indices = @transform_4, window_bounds = array<i64: 1, 16>}, {pipeline_mode = #tpu.pipeline_mode<synchronous>, transform_indices = @transform_5, window_bounds = array<i64: 80, 32>}, {pipeline_mode = #tpu.pipeline_mode<synchronous>, transform_indices = @transform_6, window_bounds = array<i64: 1, 32>}, {pipeline_mode = #tpu.pipeline_mode<synchronous>, transform_indices = @transform_7, window_bounds = array<i64: 1, 32>}, {pipeline_mode = #tpu.pipeline_mode<synchronous>, transform_indices = @transform_8, window_bounds = array<i64: 1, 32>}, {pipeline_mode = #tpu.pipeline_mode<synchronous>, transform_indices = @transform_9, window_bounds = array<i64: 160, 16>}, {pipeline_mode = #tpu.pipeline_mode<synchronous>, transform_indices = @transform_10, window_bounds = array<i64: 1, 16>}, {transform_indices = @transform_11, window_bounds = array<i64: 32, 16>}]} {
    %0 = tpu.iota {dimensions = array<i32: 0>} : vector<32x1xi32>
    %c16_i32 = arith.constant 16 : i32
    %c0_i32 = arith.constant 0 : i32
    %1 = arith.cmpi eq, %c16_i32, %c0_i32 : i32
    %c1_i32 = arith.constant 1 : i32
    %2 = arith.select %1, %c1_i32, %c16_i32 : i32
    %3 = vector.broadcast %2 : i32 to vector<32x1xi32>
    %4 = arith.remsi %0, %3 : vector<32x1xi32>
    %c0_i32_0 = arith.constant 0 : i32
    %5 = vector.broadcast %c0_i32_0 : i32 to vector<32x1xi32>
    %6 = arith.cmpi ne, %4, %5 : vector<32x1xi32>
    %c0_i32_1 = arith.constant 0 : i32
    %7 = vector.broadcast %c0_i32_1 : i32 to vector<32x1xi32>
    %8 = arith.cmpi slt, %4, %7 : vector<32x1xi32>
    %c0_i32_2 = arith.constant 0 : i32
    %9 = arith.cmpi slt, %2, %c0_i32_2 : i32
    %10 = vector.broadcast %9 : i1 to vector<32x1xi1>
    %11 = vector.broadcast %10 : vector<32x1xi1> to vector<32x1xi1>
    %12 = arith.xori %8, %11 : vector<32x1xi1>
    %13 = arith.andi %12, %6 : vector<32x1xi1>
    %14 = vector.broadcast %2 : i32 to vector<32x1xi32>
    %15 = arith.addi %4, %14 : vector<32x1xi32>
    %16 = arith.select %13, %15, %4 : vector<32x1xi1>, vector<32x1xi32>
    %c0 = arith.constant 0 : index
    %c0_3 = arith.constant 0 : index
    %17 = vector.load %arg1[%c0, %c0_3] : memref<32x32xbf16, #tpu.memory_space<vmem>>, vector<32x32xbf16>
    %c0_4 = arith.constant 0 : index
    %c0_5 = arith.constant 0 : index
    %18 = vector.load %arg2[%c0_4, %c0_5] : memref<32x32xbf16, #tpu.memory_space<vmem>>, vector<32x32xbf16>
    %cst = arith.constant dense<0.000000e+00> : vector<32x32xf32>
    %19 = tpu.matmul %17, %18, %cst {dimension_numbers = #tpu.dot_dimension_numbers<[1], [0], [0], [1], [0, 0, 1, 1], [], []>} : vector<32x32xbf16>, vector<32x32xbf16>, vector<32x32xf32> -> vector<32x32xf32>
    %c0_6 = arith.constant 0 : index
    %c0_7 = arith.constant 0 : index
    %20 = vector.load %arg3[%c0_6, %c0_7] : memref<1x32xf32, #tpu.memory_space<vmem>>, vector<1x32xf32>
    %21 = vector.broadcast %20 : vector<1x32xf32> to vector<32x32xf32>
    %22 = arith.addf %19, %21 : vector<32x32xf32>
    %cst_8 = arith.constant 0.000000e+00 : f32
    %23 = vector.broadcast %cst_8 : f32 to vector<32x32xf32>
    %24 = arith.maximumf %22, %23 : vector<32x32xf32>
    %25 = arith.truncf %24 : vector<32x32xf32> to vector<32x32xbf16>
    %c0_9 = arith.constant 0 : index
    %c0_10 = arith.constant 0 : index
    %26 = vector.load %arg4[%c0_9, %c0_10] : memref<32x16xbf16, #tpu.memory_space<vmem>>, vector<32x16xbf16>
    %cst_11 = arith.constant dense<0.000000e+00> : vector<32x16xf32>
    %27 = tpu.matmul %25, %26, %cst_11 {dimension_numbers = #tpu.dot_dimension_numbers<[1], [0], [0], [1], [0, 0, 1, 1], [], []>} : vector<32x32xbf16>, vector<32x16xbf16>, vector<32x16xf32> -> vector<32x16xf32>
    %c0_12 = arith.constant 0 : index
    %c0_13 = arith.constant 0 : index
    %28 = vector.load %arg5[%c0_12, %c0_13] : memref<1x16xf32, #tpu.memory_space<vmem>>, vector<1x16xf32>
    %29 = vector.broadcast %28 : vector<1x16xf32> to vector<32x16xf32>
    %30 = arith.addf %27, %29 : vector<32x16xf32>
    %31 = math.tanh %30 : vector<32x16xf32>
    %c2_i32 = arith.constant 2 : i32
    %32 = tpu.dynamic_rotate %31 by %c2_i32 dim 0 : vector<32x16xf32>, i32 -> vector<32x16xf32>
    %c2_i32_14 = arith.constant 2 : i32
    %33 = vector.broadcast %c2_i32_14 : i32 to vector<32x1xi32>
    %34 = arith.cmpi sge, %16, %33 : vector<32x1xi32>
    %cst_15 = arith.constant 0.000000e+00 : f32
    %35 = vector.broadcast %cst_15 : f32 to vector<32x16xf32>
    %36 = vector.shape_cast %34 : vector<32x1xi1> to vector<32x1xi1>
    %37 = vector.broadcast %36 : vector<32x1xi1> to vector<32x16xi1>
    %38 = arith.select %37, %32, %35 : vector<32x16xi1>, vector<32x16xf32>
    %c1_i32_16 = arith.constant 1 : i32
    %39 = tpu.dynamic_rotate %31 by %c1_i32_16 dim 0 : vector<32x16xf32>, i32 -> vector<32x16xf32>
    %c1_i32_17 = arith.constant 1 : i32
    %40 = vector.broadcast %c1_i32_17 : i32 to vector<32x1xi32>
    %41 = arith.cmpi sge, %16, %40 : vector<32x1xi32>
    %cst_18 = arith.constant 0.000000e+00 : f32
    %42 = vector.broadcast %cst_18 : f32 to vector<32x16xf32>
    %43 = vector.shape_cast %41 : vector<32x1xi1> to vector<32x1xi1>
    %44 = vector.broadcast %43 : vector<32x1xi1> to vector<32x16xi1>
    %45 = arith.select %44, %39, %42 : vector<32x16xi1>, vector<32x16xf32>
    %c31_i32 = arith.constant 31 : i32
    %46 = tpu.dynamic_rotate %31 by %c31_i32 dim 0 : vector<32x16xf32>, i32 -> vector<32x16xf32>
    %c15_i32 = arith.constant 15 : i32
    %47 = vector.broadcast %c15_i32 : i32 to vector<32x1xi32>
    %48 = arith.cmpi slt, %16, %47 : vector<32x1xi32>
    %cst_19 = arith.constant 0.000000e+00 : f32
    %49 = vector.broadcast %cst_19 : f32 to vector<32x16xf32>
    %50 = vector.shape_cast %48 : vector<32x1xi1> to vector<32x1xi1>
    %51 = vector.broadcast %50 : vector<32x1xi1> to vector<32x16xi1>
    %52 = arith.select %51, %46, %49 : vector<32x16xi1>, vector<32x16xf32>
    %c30_i32 = arith.constant 30 : i32
    %53 = tpu.dynamic_rotate %31 by %c30_i32 dim 0 : vector<32x16xf32>, i32 -> vector<32x16xf32>
    %c14_i32 = arith.constant 14 : i32
    %54 = vector.broadcast %c14_i32 : i32 to vector<32x1xi32>
    %55 = arith.cmpi slt, %16, %54 : vector<32x1xi32>
    %cst_20 = arith.constant 0.000000e+00 : f32
    %56 = vector.broadcast %cst_20 : f32 to vector<32x16xf32>
    %57 = vector.shape_cast %55 : vector<32x1xi1> to vector<32x1xi1>
    %58 = vector.broadcast %57 : vector<32x1xi1> to vector<32x16xi1>
    %59 = arith.select %58, %53, %56 : vector<32x16xi1>, vector<32x16xf32>
    %60 = tpu.concatenate %38, %45, %31, %52, %59 in 1 : vector<32x16xf32>, vector<32x16xf32>, vector<32x16xf32>, vector<32x16xf32>, vector<32x16xf32> -> vector<32x80xf32>
    %61 = arith.truncf %60 : vector<32x80xf32> to vector<32x80xbf16>
    %c0_21 = arith.constant 0 : index
    %c0_22 = arith.constant 0 : index
    %62 = vector.load %arg6[%c0_21, %c0_22] : memref<80x32xbf16, #tpu.memory_space<vmem>>, vector<80x32xbf16>
    %cst_23 = arith.constant dense<0.000000e+00> : vector<32x32xf32>
    %63 = tpu.matmul %61, %62, %cst_23 {dimension_numbers = #tpu.dot_dimension_numbers<[1], [0], [0], [1], [0, 0, 1, 1], [], []>} : vector<32x80xbf16>, vector<80x32xbf16>, vector<32x32xf32> -> vector<32x32xf32>
    %c0_24 = arith.constant 0 : index
    %c0_25 = arith.constant 0 : index
    %64 = vector.load %arg7[%c0_24, %c0_25] : memref<1x32xf32, #tpu.memory_space<vmem>>, vector<1x32xf32>
    %65 = vector.broadcast %64 : vector<1x32xf32> to vector<32x32xf32>
    %66 = arith.addf %63, %65 : vector<32x32xf32>
    %c0_26 = arith.constant 0 : index
    %c0_27 = arith.constant 0 : index
    %67 = vector.load %arg8[%c0_26, %c0_27] : memref<1x32xf32, #tpu.memory_space<vmem>>, vector<1x32xf32>
    %68 = vector.broadcast %67 : vector<1x32xf32> to vector<32x32xf32>
    %69 = arith.mulf %66, %68 : vector<32x32xf32>
    %c0_28 = arith.constant 0 : index
    %c0_29 = arith.constant 0 : index
    %70 = vector.load %arg9[%c0_28, %c0_29] : memref<1x32xf32, #tpu.memory_space<vmem>>, vector<1x32xf32>
    %71 = vector.broadcast %70 : vector<1x32xf32> to vector<32x32xf32>
    %72 = arith.addf %69, %71 : vector<32x32xf32>
    %73 = math.tanh %72 : vector<32x32xf32>
    %c2_i32_30 = arith.constant 2 : i32
    %74 = tpu.dynamic_rotate %73 by %c2_i32_30 dim 0 : vector<32x32xf32>, i32 -> vector<32x32xf32>
    %c2_i32_31 = arith.constant 2 : i32
    %75 = vector.broadcast %c2_i32_31 : i32 to vector<32x1xi32>
    %76 = arith.cmpi sge, %16, %75 : vector<32x1xi32>
    %cst_32 = arith.constant 0.000000e+00 : f32
    %77 = vector.broadcast %cst_32 : f32 to vector<32x32xf32>
    %78 = vector.shape_cast %76 : vector<32x1xi1> to vector<32x1xi1>
    %79 = vector.broadcast %78 : vector<32x1xi1> to vector<32x32xi1>
    %80 = arith.select %79, %74, %77 : vector<32x32xi1>, vector<32x32xf32>
    %c1_i32_33 = arith.constant 1 : i32
    %81 = tpu.dynamic_rotate %73 by %c1_i32_33 dim 0 : vector<32x32xf32>, i32 -> vector<32x32xf32>
    %c1_i32_34 = arith.constant 1 : i32
    %82 = vector.broadcast %c1_i32_34 : i32 to vector<32x1xi32>
    %83 = arith.cmpi sge, %16, %82 : vector<32x1xi32>
    %cst_35 = arith.constant 0.000000e+00 : f32
    %84 = vector.broadcast %cst_35 : f32 to vector<32x32xf32>
    %85 = vector.shape_cast %83 : vector<32x1xi1> to vector<32x1xi1>
    %86 = vector.broadcast %85 : vector<32x1xi1> to vector<32x32xi1>
    %87 = arith.select %86, %81, %84 : vector<32x32xi1>, vector<32x32xf32>
    %c31_i32_36 = arith.constant 31 : i32
    %88 = tpu.dynamic_rotate %73 by %c31_i32_36 dim 0 : vector<32x32xf32>, i32 -> vector<32x32xf32>
    %c15_i32_37 = arith.constant 15 : i32
    %89 = vector.broadcast %c15_i32_37 : i32 to vector<32x1xi32>
    %90 = arith.cmpi slt, %16, %89 : vector<32x1xi32>
    %cst_38 = arith.constant 0.000000e+00 : f32
    %91 = vector.broadcast %cst_38 : f32 to vector<32x32xf32>
    %92 = vector.shape_cast %90 : vector<32x1xi1> to vector<32x1xi1>
    %93 = vector.broadcast %92 : vector<32x1xi1> to vector<32x32xi1>
    %94 = arith.select %93, %88, %91 : vector<32x32xi1>, vector<32x32xf32>
    %c30_i32_39 = arith.constant 30 : i32
    %95 = tpu.dynamic_rotate %73 by %c30_i32_39 dim 0 : vector<32x32xf32>, i32 -> vector<32x32xf32>
    %c14_i32_40 = arith.constant 14 : i32
    %96 = vector.broadcast %c14_i32_40 : i32 to vector<32x1xi32>
    %97 = arith.cmpi slt, %16, %96 : vector<32x1xi32>
    %cst_41 = arith.constant 0.000000e+00 : f32
    %98 = vector.broadcast %cst_41 : f32 to vector<32x32xf32>
    %99 = vector.shape_cast %97 : vector<32x1xi1> to vector<32x1xi1>
    %100 = vector.broadcast %99 : vector<32x1xi1> to vector<32x32xi1>
    %101 = arith.select %100, %95, %98 : vector<32x32xi1>, vector<32x32xf32>
    %102 = tpu.concatenate %80, %87, %73, %94, %101 in 1 : vector<32x32xf32>, vector<32x32xf32>, vector<32x32xf32>, vector<32x32xf32>, vector<32x32xf32> -> vector<32x160xf32>
    %103 = arith.truncf %102 : vector<32x160xf32> to vector<32x160xbf16>
    %c0_42 = arith.constant 0 : index
    %c0_43 = arith.constant 0 : index
    %104 = vector.load %arg10[%c0_42, %c0_43] : memref<160x16xbf16, #tpu.memory_space<vmem>>, vector<160x16xbf16>
    %cst_44 = arith.constant dense<0.000000e+00> : vector<32x16xf32>
    %105 = tpu.matmul %103, %104, %cst_44 {dimension_numbers = #tpu.dot_dimension_numbers<[1], [0], [0], [1], [0, 0, 1, 1], [], []>} : vector<32x160xbf16>, vector<160x16xbf16>, vector<32x16xf32> -> vector<32x16xf32>
    %c0_45 = arith.constant 0 : index
    %c0_46 = arith.constant 0 : index
    %106 = vector.load %arg11[%c0_45, %c0_46] : memref<1x16xf32, #tpu.memory_space<vmem>>, vector<1x16xf32>
    %107 = vector.broadcast %106 : vector<1x16xf32> to vector<32x16xf32>
    %108 = arith.addf %105, %107 : vector<32x16xf32>
    %109 = arith.addf %31, %108 : vector<32x16xf32>
    %c0_47 = arith.constant 0 : index
    %c0_48 = arith.constant 0 : index
    %110 = vector.load %arg12[%c0_47, %c0_48] : memref<32x16xf32, #tpu.memory_space<vmem>>, vector<32x16xf32>
    tpu.vector_store %arg12[%c0_47, %c0_48], %109 {strides = array<i32>} : memref<32x16xf32, #tpu.memory_space<vmem>>, vector<32x16xf32>,
    return
  }
  func.func @transform_0(%arg0: i32) -> (i32, i32) {
    %c0_i32 = arith.constant 0 : i32
    %c0_i32_0 = arith.constant 0 : i32
    return %arg0, %c0_i32 : i32, i32
  }
  func.func @transform_1(%arg0: i32) -> (i32, i32) {
    %c0_i32 = arith.constant 0 : i32
    %c0_i32_0 = arith.constant 0 : i32
    %c0_i32_1 = arith.constant 0 : i32
    return %c0_i32, %c0_i32_0 : i32, i32
  }
  func.func @transform_2(%arg0: i32) -> (i32, i32) {
    %c0_i32 = arith.constant 0 : i32
    %c0_i32_0 = arith.constant 0 : i32
    %c0_i32_1 = arith.constant 0 : i32
    return %c0_i32, %c0_i32_0 : i32, i32
  }
  func.func @transform_3(%arg0: i32) -> (i32, i32) {
    %c0_i32 = arith.constant 0 : i32
    %c0_i32_0 = arith.constant 0 : i32
    %c0_i32_1 = arith.constant 0 : i32
    return %c0_i32, %c0_i32_0 : i32, i32
  }
  func.func @transform_4(%arg0: i32) -> (i32, i32) {
    %c0_i32 = arith.constant 0 : i32
    %c0_i32_0 = arith.constant 0 : i32
    %c0_i32_1 = arith.constant 0 : i32
    return %c0_i32, %c0_i32_0 : i32, i32
  }
  func.func @transform_5(%arg0: i32) -> (i32, i32) {
    %c0_i32 = arith.constant 0 : i32
    %c0_i32_0 = arith.constant 0 : i32
    %c0_i32_1 = arith.constant 0 : i32
    return %c0_i32, %c0_i32_0 : i32, i32
  }
  func.func @transform_6(%arg0: i32) -> (i32, i32) {
    %c0_i32 = arith.constant 0 : i32
    %c0_i32_0 = arith.constant 0 : i32
    %c0_i32_1 = arith.constant 0 : i32
    return %c0_i32, %c0_i32_0 : i32, i32
  }
  func.func @transform_7(%arg0: i32) -> (i32, i32) {
    %c0_i32 = arith.constant 0 : i32
    %c0_i32_0 = arith.constant 0 : i32
    %c0_i32_1 = arith.constant 0 : i32
    return %c0_i32, %c0_i32_0 : i32, i32
  }
  func.func @transform_8(%arg0: i32) -> (i32, i32) {
    %c0_i32 = arith.constant 0 : i32
    %c0_i32_0 = arith.constant 0 : i32
    %c0_i32_1 = arith.constant 0 : i32
    return %c0_i32, %c0_i32_0 : i32, i32
  }
  func.func @transform_9(%arg0: i32) -> (i32, i32) {
    %c0_i32 = arith.constant 0 : i32
    %c0_i32_0 = arith.constant 0 : i32
    %c0_i32_1 = arith.constant 0 : i32
    return %c0_i32, %c0_i32_0 : i32, i32
  }
  func.func @transform_10(%arg0: i32) -> (i32, i32) {
    %c0_i32 = arith.constant 0 : i32
    %c0_i32_0 = arith.constant 0 : i32
    %c0_i32_1 = arith.constant 0 : i32
    return %c0_i32, %c0_i32_0 : i32, i32
  }
  func.func @transform_11(%arg0: i32) -> (i32, i32) {
    %c0_i32 = arith.constant 0 : i32
    %c0_i32_0 = arith.constant 0 : i32
    return %arg0, %c0_i32 : i32, i32
  }
}

</mosaic_0001>

<bundles_post_ra>
// kernel: tpu_custom_call.1
= control target key start
LH: loop header
LB: loop body
LE: loop exit
PB: predicated region body
PF: predicated region fallthrough
CT: control target
= control target key end

     0   :  { %vm129_vm0 = vcmask 261120   ;;  %v39_v21 = vlaneseq  ;;  %s1047_s15 = smov 32   ;;  %s1048_s18 = smov 16   ;;  %vm1458_vm13 = vcmask 130048   ;;  %vm446_vm14 = vcmask 392192   ;;  %s1446_s1 = inlined_call_operand.vmem [shape: bf16[32,32], index: 1, kind: input, shape index: {}]   ;;  %s1447_s0 = inlined_call_operand.vmem [shape: bf16[32,32], index: 0, kind: input, shape index: {}]   ;;  %s1448_s3 = inlined_call_operand.vmem [shape: bf16[32,16], index: 3, kind: input, shape index: {}]   ;;  %s1449_s2 = inlined_call_operand.vmem [shape: f32[1,32], index: 2, kind: input, shape index: {}]   ;;  %s1450_s4 = inlined_call_operand.vmem [shape: f32[1,16], index: 4, kind: input, shape index: {}]   ;;  %s1451_s5 = inlined_call_operand.vmem [shape: bf16[80,32], index: 5, kind: input, shape index: {}]   ;;  %s1452_s9 = inlined_call_operand.vmem [shape: bf16[160,16], index: 9, kind: input, shape index: {}]   ;;  %s1453_s6 = inlined_call_operand.vmem [shape: f32[1,32], index: 6, kind: input, shape index: {}]   ;;  %s1454_s7 = inlined_call_operand.vmem [shape: f32[1,32], index: 7, kind: input, shape index: {}]   ;;  %s1455_s8 = inlined_call_operand.vmem [shape: f32[1,32], index: 8, kind: input, shape index: {}]   ;;  %s1456_s10 = inlined_call_operand.vmem [shape: f32[1,16], index: 10, kind: input, shape index: {}]   ;;  %s1457_s11 = inlined_call_operand.vmem [shape: f32[32,16], index: 11, kind: output, shape index: {}]  }
   0x1   :  { %v1010_v0 = vld [vmem:[%s1446_s1] sm:$0xff]   ;;  %v1011_v1 = vld [vmem:[%s1446_s1 + $0x8] sm:$0xff]   ;;  %v1018_v52 = vld [vmem:[%s1451_s5 + $0x10] sm:$0xff]   ;;  %s1049_s21 = smov 48   ;;  %vm451_vm15 = vcmask 523264  }
   0x2   :  { %904 = vmatprep.subr.bf16.mxu0 %v1010_v0  ;;  %v1012_v2 = vld [vmem:[%s1447_s0] sm:$0xff]   ;;  %v1013_v3 = vld [vmem:[%s1447_s0 + $0x8] sm:$0xff]   ;;  %v1141_v26 = vshrl.u32 %v39_v21, 7 }
   0x3   :  { %905 = vmatpush3.bf16.msra.mxu0 %v1010_v0  ;;  %908 = vmatprep.mubr.msk.bf16.mxu0 %vm129_vm0, %v1012_v2  ;;  %v1014_v4 = vld [vmem:[%s1448_s3] sm:$0xff]   ;;  %v1015_v5 = vld [vmem:[%s1448_s3 + $0x8] sm:$0xff]  }
   0x4   :  { %906 = vmatprep.subr.bf16.mxu0 %v1011_v1  ;;  %v854_v6 = vld [vmem:[%s1449_s2] ss:$0 sm:$0xff]  ;;  %v43_v32 = vadd.s32 24, %v1141_v26  ;;  %v1145_v33 = vadd.s32 16, %v1141_v26  ;;  %v48_v35 = vand.u32 15, %v1141_v26  ;;  %v1017_v37 = vld [vmem:[%s1451_s5 + $0x8] sm:$0xff]  }
   0x5   :  { %v861_v22 = vld [vmem:[%s1450_s4] ss:$0 sm:$0xff]  ;;  %v1158_v40 = vadd.s32 8, %v1141_v26  ;;  %vm302_vm1 = vcmp.lt.s32.totalorder %v1141_v26, 1  ;;  %vm327_vm2 = vcmp.lt.s32.totalorder %v1141_v26, 7  ;;  %vm352_vm3 = vcmp.lt.s32.totalorder %v1141_v26, 6 }
   0x6   :  { %v1016_v34 = vld [vmem:[%s1451_s5] sm:$0xff]   ;;  %v69_v36 = vand.u32 15, %v43_v32  ;;  %v62_v38 = vand.u32 15, %v1145_v33  ;;  %vm1170_vm4 = vcmp.ge.s32.totalorder %v48_v35, 1  ;;  %vm277_vm10 = vcmp.lt.s32.totalorder %v1141_v26, 2 }
   0x7   :  { %907 = vmatpush3.bf16.msra.mxu0 %v1011_v1  ;;  %v55_v56 = vand.u32 15, %v1158_v40  ;;  %vm1278_vm12 = vcmp.ge.s32.totalorder %v48_v35, 2 }
   0x8   :  { %912 = vmatprep.subr.bf16.mxu0 %v1014_v4  ;;  %vm1175_vm5 = vcmp.lt.s32.totalorder %v69_v36, 15  ;;  %vm1187_vm6 = vcmp.ge.s32.totalorder %v62_v38, 1  ;;  %vm1223_vm7 = vcmp.lt.s32.totalorder %v69_v36, 14  ;;  %vm1272_vm11 = vcmp.ge.s32.totalorder %v62_v38, 2 }
   0x9   :  { %vm1232_vm8 = vcmp.lt.s32.totalorder %v55_v56, 15  ;;  %vm1253_vm9 = vcmp.lt.s32.totalorder %v55_v56, 14 }
   0xa   :  { %909 = vmatmul.mubr.msk.bf16.vlgmr.msra.gmra.mrb[0].mxu0 %vm129_vm0, %v1013_v3  ;;  %v1019_v3 = vld [vmem:[%s1451_s5 + $0x18] sm:$0xff]  }
   0xb   :  { %913 = vmatpush3.bf16.msra.mxu0 %v1014_v4 }
   0xc   :  { %914 = vmatprep.subr.bf16.mxu0 %v1015_v5 }
   0xf   :  { %915 = vmatpush3.bf16.msra.mxu0 %v1015_v5 }
  0x10   :  { %920 = vmatprep.subr.bf16.mxu0 %v1016_v34 }
  0xdd   :  { %v910_v7 = vpop.f32.mrb[0].mxu0 }
  0xde   :  { %v179_v8 = vadd.f32 %v910_v7, %v854_v6  ;;  %v170_v9 = vpop.f32.mrb[1].mxu0 }
  0xdf   :  { %v171_v10 = vadd.f32 %v854_v6, %v170_v9  ;;  %v911_v11 = vpop.f32.mrb[2].mxu0 }
  0xe0   :  { %v182_v12 = vadd.f32 %v911_v11, %v854_v6  ;;  %v173_v13 = vpop.f32.mrb[3].mxu0  ;;  %v187_v15 = vmax.f32 %v179_v8, 0.0 }
  0xe1   :  { %v174_v14 = vadd.f32 %v854_v6, %v173_v13  ;;  %v185_v17 = vmax.f32 %v171_v10, 0.0 }
  0xe2   :  { %v188_v16 = vmax.f32 %v182_v12, 0.0 }
  0xe3   :  { %v186_v18 = vmax.f32 %v174_v14, 0.0 }
  0xe4   :  { %v190_v19 = vpack.c.bf16 %v188_v16, %v187_v15  ;;  %v1020_v16 = vld [vmem:[%s1451_s5 + $0x20] sm:$0xff]   ;;  %s1050_s5 = smov 64  }
  0xe5   :  { %v189_v20 = vpack.c.bf16 %v186_v18, %v185_v17 }
  0xe7   :  { %916 = vmatprep.mubr.msk.bf16.mxu0 %vm129_vm0, %v189_v20 }
  0xe8   :  { %917 = vmatmul.mubr.msk.bf16.vlgmr.msra.gmra.mrb[4].mxu0 %vm129_vm0, %v190_v19 }
  0xe9   :  { %921 = vmatpush3.bf16.msra.mxu0 %v1016_v34 }
  0xea   :  { %922 = vmatprep.subr.bf16.mxu0 %v1017_v37 }
  0xed   :  { %923 = vmatpush3.bf16.msra.mxu0 %v1017_v37 }
  0xee   :  { %924 = vmatprep.subr.bf16.mxu0 %v1018_v52 }
  0xf1   :  { %925 = vmatpush3.bf16.msra.mxu0 %v1018_v52 }
  0xf2   :  { %926 = vmatprep.subr.bf16.mxu0 %v1019_v3 }
  0xf5   :  { %927 = vmatpush3.bf16.msra.mxu0 %v1019_v3 }
  0xf6   :  { %928 = vmatprep.subr.bf16.mxu0 %v1020_v16 }
  0xf9   :  { %929 = vmatpush3.bf16.msra.mxu0 %v1020_v16 }
 0x1bb   :  { %v918_v23 = vpop.f32.mrb[4].mxu0 }
 0x1bc   :  { %v263_v24 = vadd.f32 %v918_v23, %v861_v22  ;;  %v254_v25 = vpop.f32.mrb[5].mxu0 }
 0x1bd   :  { %v255_v27 = vadd.f32 %v861_v22, %v254_v25  ;;  %v919_v28 = vpop.f32.mrb[6].mxu0 }
 0x1be   :  { %1031 = vtanh.f32 %v263_v24  ;;  %v266_v29 = vadd.f32 %v919_v28, %v861_v22  ;;  %v257_v30 = vpop.f32.mrb[7].mxu0 }
 0x1bf   :  { %1033 = vtanh.f32 %v255_v27  ;;  %v258_v31 = vadd.f32 %v861_v22, %v257_v30 }
 0x1c0   :  { %1035 = vtanh.f32 %v266_v29 }
 0x1c1   :  { %1037 = vtanh.f32 %v258_v31 }
 0x1c8   :  { %v1155_v39 = vpop.eup %1031 }
 0x1c9   :  { %v1160_v41 = vpop.eup %1033  ;;  %v300_v54 = vrot.slane %v1155_v39, 7  ;;  %v325_v63 = vrot.slane %v1155_v39, 1  ;;  %v350_v13 = vrot.slane %v1155_v39, 2  ;;  %v275_v37 = vrot.slane %v1155_v39, 6 }
 0x1ca   :  { %v1165_v42 = vpop.eup %1035  ;;  %v298_v43 = vrot.slane %v1160_v41, 7  ;;  %v323_v45 = vrot.slane %v1160_v41, 1  ;;  %v348_v55 = vrot.slane %v1160_v41, 2  ;;  %v273_v36 = vrot.slane %v1160_v41, 6 }
 0x1cb   :  { %v1179_v47 = vpop.eup %1037  ;;  %v940_v48 = vpack.i.bf16 %v1165_v42, %v1155_v39  ;;  %v301_v49 = vrot.slane %v1165_v42, 7  ;;  %v326_v50 = vrot.slane %v1165_v42, 1  ;;  %v351_v59 = vrot.slane %v1165_v42, 2 }
 0x1cc   :  { %v299_v53 = vrot.slane %v1179_v47, 7  ;;  %v324_v60 = vrot.slane %v1179_v47, 1  ;;  %v945_v1 = vpack.i.bf16 %v1179_v47, %v1160_v41  ;;  %v349_v11 = vrot.slane %v1179_v47, 2 }
 0x1cd   :  { %941 = vrot.lane.b32.xlu1 %v940_v48, %s1047_s15  ;;  %v306_v57 = vsel %vm302_vm1, %v301_v49, %v298_v43  ;;  %v331_v58 = vsel %vm327_vm2, %v326_v50, %v323_v45  ;;  %v328_v4 = vsel %vm327_vm2, %v325_v63, %v326_v50  ;;  %v356_v8 = vsel %vm352_vm3, %v351_v59, %v348_v55 }
 0x1ce   :  { %v305_v61 = vsel %vm302_vm1, %v298_v43, %v299_v53  ;;  %v319_v62 = vsel %vm1170_vm4, %v306_v57, 0.0  ;;  %v304_v0 = vsel %vm302_vm1, %v299_v53, %v300_v54  ;;  %v347_v5 = vsel %vm1175_vm5, %v331_v58, 0.0 }
 0x1cf   :  { %v950_v2 = vpack.i.bf16 %v305_v61, %v319_v62  ;;  %v321_v6 = vsel %vm1187_vm6, %v304_v0, 0.0  ;;  %v329_v9 = vsel %vm327_vm2, %v324_v60, %v325_v63  ;;  %v303_v12 = vsel %vm302_vm1, %v300_v54, %v301_v49 }
 0x1d0   :  { %v955_v14 = vpack.i.bf16 %v347_v5, %v328_v4  ;;  %v960_v15 = vpack.i.bf16 %v303_v12, %v321_v6  ;;  %v353_v17 = vsel %vm352_vm3, %v350_v13, %v351_v59  ;;  %v372_v18 = vsel %vm1223_vm7, %v356_v8, 0.0 }
 0x1d1   :  { %946 = vrot.lane.b32.xlu1 %v945_v1, %s1047_s15  ;;  %951 = vrot.lane.b32.xlu0 %v950_v2, %s1048_s18  ;;  %v330_v19 = vsel %vm327_vm2, %v323_v45, %v324_v60  ;;  %v345_v20 = vsel %vm1232_vm8, %v329_v9, 0.0  ;;  %v354_v21 = vsel %vm352_vm3, %v349_v11, %v350_v13  ;;  %v975_v23 = vpack.i.bf16 %v372_v18, %v353_v17 }
 0x1d2   :  { %v965_v24 = vpack.i.bf16 %v345_v20, %v330_v19  ;;  %v355_v25 = vsel %vm352_vm3, %v348_v55, %v349_v11  ;;  %v370_v27 = vsel %vm1253_vm9, %v354_v21, 0.0  ;;  %v274_v30 = vrot.slane %v1179_v47, 6 }
 0x1d3   :  { %v970_v28 = vpack.i.bf16 %v370_v27, %v355_v25  ;;  %v276_v32 = vrot.slane %v1165_v42, 6 }
 0x1d4   :  { %v279_v40 = vsel %vm277_vm10, %v274_v30, %v275_v37  ;;  %v280_v57 = vsel %vm277_vm10, %v273_v36, %v274_v30  ;;  %v1051_v30 = vmov 0  }
 0x1d5   :  { %956 = vrot.lane.b32.xlu1 %v955_v14, %s1049_s21  ;;  %961 = vrot.lane.b32.xlu0 %v960_v15, %s1048_s18  ;;  %v281_v48 = vsel %vm277_vm10, %v276_v32, %v273_v36  ;;  %v278_v56 = vsel %vm277_vm10, %v275_v37, %v276_v32  ;;  %v296_v35 = vsel %vm1272_vm11, %v279_v40, 0.0  ;;  %v1022_v32 = vld [vmem:[%s1452_s9 + $0x8] sm:$0xff]   ;;  %v1024_v36 = vld [vmem:[%s1452_s9 + $0x18] sm:$0xff]  }
 0x1d6   :  { %v294_v58 = vsel %vm1278_vm12, %v281_v48, 0.0  ;;  %793 = vmatprep.subr.bf16.mxu1 %v1051_v30  ;;  %v1025_v37 = vld [vmem:[%s1452_s9 + $0x20] sm:$0xff]   ;;  %v1026_v40 = vld [vmem:[%s1452_s9 + $0x28] sm:$0xff]   ;;  %v1027_v48 = vld [vmem:[%s1452_s9 + $0x30] sm:$0xff]  }
 0x1d9   :  { %976 = vrot.lane.b32.xlu1 %v975_v23, %s1050_s5  ;;  %966 = vrot.lane.b32.xlu0 %v965_v24, %s1049_s21 }
 0x1dd   :  { %971 = vrot.lane.b32.xlu0 %v970_v28, %s1050_s5 }
 0x23f   :  { %v942_v29 = vpop.permute.xlu1 %941 }
 0x240   :  { %v944_v54 = vunpack.i.h.bf16 %v942_v29  ;;  %v943_v55 = vunpack.i.l.bf16 %v942_v29 }
 0x243   :  { %v947_v31 = vpop.permute.xlu1 %946  ;;  %v952_v34 = vpop.permute.xlu0 %951 }
 0x244   :  { %v954_v52 = vunpack.i.h.bf16 %v952_v34  ;;  %v953_v53 = vunpack.i.l.bf16 %v952_v34  ;;  %v949_v61 = vunpack.i.h.bf16 %v947_v31  ;;  %v948_v62 = vunpack.i.l.bf16 %v947_v31  ;;  %v1021_v31 = vld [vmem:[%s1452_s9] sm:$0xff]   ;;  %v1023_v34 = vld [vmem:[%s1452_s9 + $0x10] sm:$0xff]  }
 0x245   :  { %794 = vmatpush1.bf16.msra.mxu1 %v1021_v31 }
 0x246   :  { %v438_v3 = vsel %vm1458_vm13, %v294_v58, %v953_v53  ;;  %v439_v4 = vsel %vm1458_vm13, %v280_v57, %v954_v52  ;;  %795 = vmatprep.subr.bf16.mxu1 %v1051_v30  ;;  %v874_v52 = vld [vmem:[%s1454_s7] ss:$0 sm:$0xff] }
 0x247   :  { %v957_v49 = vpop.permute.xlu1 %956  ;;  %v962_v50 = vpop.permute.xlu0 %961  ;;  %v442_v16 = vsel %vm129_vm0, %v438_v3, %v948_v62  ;;  %v443_v17 = vsel %vm129_vm0, %v439_v4, %v949_v61  ;;  %v1029_v3 = vld [vmem:[%s1452_s9 + $0x40] sm:$0xff]  }
 0x248   :  { %v964_v33 = vunpack.i.h.bf16 %v962_v50  ;;  %v963_v38 = vunpack.i.l.bf16 %v962_v50  ;;  %v959_v5 = vunpack.i.h.bf16 %v957_v49  ;;  %v958_v6 = vunpack.i.l.bf16 %v957_v49  ;;  %v866_v49 = vld [vmem:[%s1453_s6] ss:$0 sm:$0xff] }
 0x249   :  { %796 = vmatpush1.bf16.msra.mxu1 %v1022_v32 }
 0x24a   :  { %v441_v59 = vsel %vm1458_vm13, %v278_v56, %v964_v33  ;;  %v440_v60 = vsel %vm1458_vm13, %v296_v35, %v963_v38  ;;  %vm505_vm13 = vcmask 654336   ;;  %797 = vmatprep.subr.bf16.mxu1 %v1051_v30  ;;  %v875_v38 = vld [vmem:[%s1455_s8] ss:$0 sm:$0xff] }
 0x24b   :  { %v445_v63 = vsel %vm129_vm0, %v441_v59, %v944_v54  ;;  %v444_v0 = vsel %vm129_vm0, %v440_v60, %v943_v55  ;;  %v977_v1 = vpop.permute.xlu1 %976  ;;  %v967_v2 = vpop.permute.xlu0 %966 }
 0x24c   :  { %v979_v8 = vunpack.i.h.bf16 %v977_v1  ;;  %v978_v9 = vunpack.i.l.bf16 %v977_v1  ;;  %v969_v11 = vunpack.i.h.bf16 %v967_v2  ;;  %v968_v12 = vunpack.i.l.bf16 %v967_v2  ;;  %v1028_v2 = vld [vmem:[%s1452_s9 + $0x38] sm:$0xff]  }
 0x24d   :  { %v449_v13 = vsel %vm446_vm14, %v444_v0, %v958_v6  ;;  %v450_v14 = vsel %vm446_vm14, %v445_v63, %v959_v5  ;;  %798 = vmatpush1.bf16.msra.mxu1 %v1023_v34 }
 0x24e   :  { %v454_v20 = vsel %vm451_vm15, %v449_v13, %v978_v9  ;;  %v455_v21 = vsel %vm451_vm15, %v450_v14, %v979_v8  ;;  %v447_v23 = vsel %vm446_vm14, %v442_v16, %v968_v12  ;;  %v448_v24 = vsel %vm446_vm14, %v443_v17, %v969_v11  ;;  %799 = vmatprep.subr.bf16.mxu1 %v1051_v30  ;;  %v1030_v12 = vld [vmem:[%s1452_s9 + $0x48] sm:$0xff]   ;;  %s1052_s9 = smov 96  }
 0x24f   :  { %v972_v15 = vpop.permute.xlu0 %971  ;;  %v457_v29 = vpack.c.bf16 %v455_v21, %v454_v20 }
 0x250   :  { %v974_v18 = vunpack.i.h.bf16 %v972_v15  ;;  %v973_v19 = vunpack.i.l.bf16 %v972_v15 }
 0x251   :  { %800 = vmatpush1.bf16.msra.mxu1 %v1024_v36 }
 0x252   :  { %v452_v25 = vsel %vm451_vm15, %v447_v23, %v973_v19  ;;  %v453_v27 = vsel %vm451_vm15, %v448_v24, %v974_v18  ;;  %801 = vmatprep.subr.bf16.mxu1 %v1051_v30 }
 0x253   :  { %v456_v28 = vpack.c.bf16 %v453_v27, %v452_v25 }
 0x255   :  { %930 = vmatprep.mubr.msk.bf16.mxu0 %vm505_vm13, %v456_v28  ;;  %802 = vmatpush1.bf16.msra.mxu1 %v1025_v37 }
 0x256   :  { %931 = vmatmul.mubr.msk.bf16.vlgmr.msra.gmra.mrb[8].mxu0 %vm505_vm13, %v457_v29  ;;  %803 = vmatprep.subr.bf16.mxu1 %v1051_v30 }
 0x259   :  { %804 = vmatpush1.bf16.msra.mxu1 %v1026_v40 }
 0x25a   :  { %805 = vmatprep.subr.bf16.mxu1 %v1051_v30 }
 0x25d   :  { %806 = vmatpush1.bf16.msra.mxu1 %v1027_v48 }
 0x25e   :  { %807 = vmatprep.subr.bf16.mxu1 %v1051_v30 }
 0x261   :  { %808 = vmatpush1.bf16.msra.mxu1 %v1028_v2 }
 0x262   :  { %809 = vmatprep.subr.bf16.mxu1 %v1051_v30 }
 0x265   :  { %810 = vmatpush1.bf16.msra.mxu1 %v1029_v3 }
 0x266   :  { %811 = vmatprep.subr.bf16.mxu1 %v1051_v30 }
 0x269   :  { %812 = vmatpush1.bf16.msra.mxu1 %v1030_v12 }
 0x329   :  { %v932_v50 = vpop.f32.mrb[8].mxu0 }
 0x32a   :  { %v555_v53 = vadd.f32 %v932_v50, %v866_v49  ;;  %v546_v33 = vpop.f32.mrb[9].mxu0 }
 0x32b   :  { %v547_v54 = vadd.f32 %v866_v49, %v546_v33  ;;  %v933_v55 = vpop.f32.mrb[10].mxu0 }
 0x32c   :  { %v570_v56 = vmul.f32 %v874_v52, %v555_v53  ;;  %v558_v35 = vadd.f32 %v933_v55, %v866_v49  ;;  %v549_v57 = vpop.f32.mrb[11].mxu0 }
 0x32d   :  { %v568_v58 = vmul.f32 %v874_v52, %v547_v54  ;;  %v550_v59 = vadd.f32 %v866_v49, %v549_v57 }
 0x32e   :  { %v581_v60 = vadd.f32 %v875_v38, %v570_v56  ;;  %v571_v61 = vmul.f32 %v874_v52, %v558_v35 }
 0x32f   :  { %v579_v62 = vadd.f32 %v875_v38, %v568_v58  ;;  %v569_v63 = vmul.f32 %v874_v52, %v550_v59 }
 0x330   :  { %1039 = vtanh.f32 %v581_v60  ;;  %v582_v0 = vadd.f32 %v875_v38, %v571_v61 }
 0x331   :  { %1041 = vtanh.f32 %v579_v62  ;;  %v580_v1 = vadd.f32 %v875_v38, %v569_v63 }
 0x332   :  { %1043 = vtanh.f32 %v582_v0 }
 0x333   :  { %1045 = vtanh.f32 %v580_v1 }
 0x33a   :  { %v1040_v4 = vpop.eup %1039 }
 0x33b   :  { %v1042_v5 = vpop.eup %1041  ;;  %v601_v6 = vrot.slane %v1040_v4, 7  ;;  %v625_v8 = vrot.slane %v1040_v4, 2  ;;  %v613_v9 = vrot.slane %v1040_v4, 1  ;;  %v589_v11 = vrot.slane %v1040_v4, 6 }
 0x33c   :  { %v1044_v13 = vpop.eup %1043  ;;  %v599_v14 = vrot.slane %v1042_v5, 7  ;;  %v623_v15 = vrot.slane %v1042_v5, 2  ;;  %v611_v16 = vrot.slane %v1042_v5, 1  ;;  %v587_v17 = vrot.slane %v1042_v5, 6 }
 0x33d   :  { %v1046_v18 = vpop.eup %1045  ;;  %v602_v19 = vrot.slane %v1044_v13, 7  ;;  %v614_v20 = vrot.slane %v1044_v13, 1  ;;  %v1000_v21 = vpack.i.bf16 %v1044_v13, %v1040_v4  ;;  %v590_v23 = vrot.slane %v1044_v13, 6 }
 0x33e   :  { %v980_v24 = vpack.i.bf16 %v1046_v18, %v1042_v5  ;;  %v600_v25 = vrot.slane %v1046_v18, 7  ;;  %v624_v27 = vrot.slane %v1046_v18, 2  ;;  %v612_v28 = vrot.slane %v1046_v18, 1 }
 0x33f   :  { %v606_v29 = vsel %vm302_vm1, %v602_v19, %v599_v14  ;;  %v603_v31 = vsel %vm302_vm1, %v601_v6, %v602_v19  ;;  %v615_v32 = vsel %vm327_vm2, %v613_v9, %v614_v20  ;;  %v618_v30 = vsel %vm327_vm2, %v614_v20, %v611_v16 }
 0x340   :  { %981 = vrot.lane.b32.xlu1 %v980_v24, %s1050_s5  ;;  %v605_v34 = vsel %vm302_vm1, %v599_v14, %v600_v25  ;;  %v607_v36 = vsel %vm1170_vm4, %v606_v29, 0.0  ;;  %v604_v37 = vsel %vm302_vm1, %v600_v25, %v601_v6  ;;  %v628_v40 = vsel %vm352_vm3, %v624_v27, %v625_v8 }
 0x341   :  { %v985_v48 = vpack.i.bf16 %v605_v34, %v607_v36  ;;  %v609_v49 = vsel %vm1187_vm6, %v604_v37, 0.0  ;;  %v629_v50 = vsel %vm352_vm3, %v623_v15, %v624_v27  ;;  %v632_v52 = vsel %vm1253_vm9, %v628_v40, 0.0  ;;  %v876_v34 = vld [vmem:[%s1456_s10] ss:$0 sm:$0xff] }
 0x342   :  { %v995_v53 = vpack.i.bf16 %v603_v31, %v609_v49  ;;  %v697_v33 = vpack.c.bf16 %v632_v52, %v629_v50  ;;  %v616_v44 = vsel %vm327_vm2, %v612_v28, %v613_v9  ;;  %v617_v38 = vsel %vm327_vm2, %v611_v16, %v612_v28 }
 0x343   :  { %986 = vrot.lane.b32.xlu0 %v985_v48, %s1047_s15  ;;  %v620_v51 = vsel %vm1232_vm8, %v616_v44, 0.0  ;;  %v622_v54 = vsel %vm1175_vm5, %v618_v30, 0.0  ;;  %v588_v55 = vrot.slane %v1046_v18, 6  ;;  %v594_v22 = vsel %vm277_vm10, %v590_v23, %v587_v17 }
 0x344   :  { %996 = vrot.lane.b32.xlu1 %v995_v53, %s1047_s15  ;;  %887 = vmatprep.mubr.msk.bf16.mxu1 %vm129_vm0, %v697_v33  ;;  %v990_v56 = vpack.i.bf16 %v620_v51, %v617_v38  ;;  %v1005_v35 = vpack.i.bf16 %v622_v54, %v615_v32  ;;  %v591_v57 = vsel %vm277_vm10, %v589_v11, %v590_v23  ;;  %v626_v58 = vrot.slane %v1044_v13, 2 }
 0x345   :  { %v593_v10 = vsel %vm277_vm10, %v587_v17, %v588_v55  ;;  %v592_v46 = vsel %vm277_vm10, %v588_v55, %v589_v11  ;;  %v595_v4 = vsel %vm1278_vm12, %v594_v22, 0.0  ;;  %vm691_vm1 = vcmask 785408  }
 0x346   :  { %v627_v59 = vsel %vm352_vm3, %v625_v8, %v626_v58  ;;  %v630_v60 = vsel %vm352_vm3, %v626_v58, %v623_v15  ;;  %v597_v20 = vsel %vm1272_vm11, %v592_v46, 0.0  ;;  %vm1475_vm2 = vcmask 130048  }
 0x347   :  { %991 = vrot.lane.b32.xlu0 %v990_v56, %s1052_s9  ;;  %v634_v61 = vsel %vm1223_vm7, %v630_v60, 0.0 }
 0x348   :  { %1006 = vrot.lane.b32.xlu1 %v1005_v35, %s1052_s9  ;;  %v699_v62 = vpack.c.bf16 %v634_v61, %v627_v59 }
 0x34b   :  { %1001 = vrot.lane.b32.xlu0 %v1000_v21, %s1050_s5 }
 0x3b2   :  { %v982_v63 = vpop.permute.xlu1 %981 }
 0x3b3   :  { %v984_v6 = vunpack.i.h.bf16 %v982_v63  ;;  %v983_v8 = vunpack.i.l.bf16 %v982_v63 }
 0x3b5   :  { %v987_v0 = vpop.permute.xlu0 %986 }
 0x3b6   :  { %v989_v1 = vunpack.i.h.bf16 %v987_v0  ;;  %v988_v2 = vunpack.i.l.bf16 %v987_v0  ;;  %v997_v3 = vpop.permute.xlu1 %996 }
 0x3b7   :  { %v999_v12 = vunpack.i.h.bf16 %v997_v3  ;;  %v998_v13 = vunpack.i.l.bf16 %v997_v3 }
 0x3b8   :  { %v683_v5 = vsel %vm129_vm0, %v595_v4, %v988_v2  ;;  %v684_v26 = vsel %vm129_vm0, %v593_v10, %v989_v1 }
 0x3b9   :  { %v992_v9 = vpop.permute.xlu0 %991  ;;  %v687_v14 = vsel %vm451_vm15, %v683_v5, %v983_v8  ;;  %v688_v15 = vsel %vm451_vm15, %v684_v26, %v984_v6  ;;  %v686_v24 = vsel %vm129_vm0, %v591_v57, %v999_v12  ;;  %v685_v25 = vsel %vm129_vm0, %v597_v20, %v998_v13 }
 0x3ba   :  { %v994_v7 = vunpack.i.h.bf16 %v992_v9  ;;  %v993_v11 = vunpack.i.l.bf16 %v992_v9  ;;  %v1007_v16 = vpop.permute.xlu1 %1006 }
 0x3bb   :  { %v1009_v27 = vunpack.i.h.bf16 %v1007_v16  ;;  %v1008_v28 = vunpack.i.l.bf16 %v1007_v16 }
 0x3bc   :  { %v692_v45 = vsel %vm691_vm1, %v687_v14, %v993_v11  ;;  %v693_v17 = vsel %vm691_vm1, %v688_v15, %v994_v7 }
 0x3bd   :  { %v1002_v18 = vpop.permute.xlu0 %1001  ;;  %v696_v19 = vpack.c.bf16 %v693_v17, %v692_v45 }
 0x3be   :  { %v1004_v21 = vunpack.i.h.bf16 %v1002_v18  ;;  %v1003_v23 = vunpack.i.l.bf16 %v1002_v18 }
 0x3bf   :  { %826 = vmatmul.mubr.bf16.vlgmr.msra.gmra.mrb[0].mxu1 %v696_v19 }
 0x3c0   :  { %v690_v29 = vsel %vm451_vm15, %v686_v24, %v1004_v21  ;;  %v689_v31 = vsel %vm451_vm15, %v685_v25, %v1003_v23  ;;  %888 = vmatprep.mubr.msk.bf16.mxu1 %vm129_vm0, %v699_v62  ;;  %vm1476_vm0 = vmmov %vm1475_vm2 }
 0x3c1   :  { %v694_v32 = vsel %vm691_vm1, %v689_v31, %v1008_v28  ;;  %v695_v43 = vsel %vm691_vm1, %v690_v29, %v1009_v27  ;;  %vm1477_vm3 = vmmov %vm1476_vm0 }
 0x3c2   :  { %v698_v30 = vpack.c.bf16 %v695_v43, %v694_v32  ;;  %vm1478_vm4 = vmmov %vm1476_vm0 }
 0x3c7   :  { %834 = vmatmul.mubr.bf16.gmra.mrb[4].mxu1 %v698_v30 }
 0x492   :  { %v827_v36 = vpop.f32.mrb[0].mxu1 }
 0x493   :  { %v828_v37 = vadd.f32 %v876_v34, %v827_v36  ;;  %v829_v40 = vpop.f32.mrb[1].mxu1 }
 0x494   :  { %v830_v48 = vpop.f32.mrb[2].mxu1 }
 0x495   :  { %v842_v49 = vadd.f32 %v1160_v41, %v828_v37  ;;  %v831_v50 = vadd.f32 %v876_v34, %v830_v48  ;;  %v832_v52 = vpop.f32.mrb[3].mxu1 }
 0x497   :  { %846 = vst.msk [vmem:[%s1457_s11] sm:$0xff] %vm1475_vm2, %v842_v49  ;;  %v843_v53 = vadd.f32 %v1179_v47, %v831_v50 }
 0x499   :  { %847 = vst.msk [vmem:[%s1457_s11 + $0x8] sm:$0xff] %vm1476_vm0, %v843_v53 }
 0x49a   :  { %v835_v33 = vpop.f32.mrb[4].mxu1 }
 0x49b   :  { %v836_v44 = vadd.f32 %v876_v34, %v835_v33  ;;  %v837_v38 = vpop.f32.mrb[5].mxu1 }
 0x49c   :  { %v838_v51 = vpop.f32.mrb[6].mxu1 }
 0x49d   :  { %v844_v41 = vadd.f32 %v1155_v39, %v836_v44  ;;  %v839_v54 = vadd.f32 %v876_v34, %v838_v51  ;;  %v840_v55 = vpop.f32.mrb[7].mxu1 }
 0x49f   :  { %848 = vst.msk [vmem:[%s1457_s11 + $0x10] sm:$0xff] %vm1477_vm3, %v844_v41  ;;  %v845_v47 = vadd.f32 %v1165_v42, %v839_v54 }
 0x4a1   :  { %849 = vst.msk [vmem:[%s1457_s11 + $0x18] sm:$0xff] %vm1478_vm4, %v845_v47 }

</bundles_post_ra>
